<compile_context>
chip_gen: v5e
topology: v5e:2x2
jax: 0.10.0
libtpu: 0.0.40
codegen_flags: <defaults>
</compile_context>

<pallas_src>
import jax
import jax.numpy as jnp
from jax.experimental import pallas as pl
from jax.experimental.pallas import tpu as pltpu


def make_divisible(v, divisor, min_value=None):
    if min_value is None:
        min_value = divisor
    new_v = max(min_value, int(v + divisor / 2) // divisor * divisor)
    if new_v < 0.9 * v:
        new_v += divisor
    return new_v


# ---------------------------------------------------------------------------
# SE (squeeze-and-excite) block
# ---------------------------------------------------------------------------

def _pack_geometry(C, HW, lane=128, sublane=8):
    """Fold spatial row-groups into sublanes: (C, HW) -> (C*G, HW//G).

    Picks the smallest G (widest lanes) such that HW//G is a multiple of 128 and,
    when possible, C*G is a multiple of 8 (full sublane occupancy for small C).
    """
    if HW % lane != 0:
        # TODO(synk): for HW not a multiple of 128 (e.g. 7x7 / 14x14 late MobileNet
        # stages) prefer an NHWC / (HW, C) layout or pad, so stores stay lane-dense.
        return 1, HW
    max_g = HW // lane
    for g in range(1, max_g + 1):
        if max_g % g == 0 and (C * g) % sublane == 0:
            return g, HW // g
    return max_g, lane


def _pick_batch_tile(B, R, L, itemsize, budget_bytes):
    """Largest batch tile Bt dividing B s.t. the (Bt*R, L) tile is sublane-legal,
    the double-buffered in+out footprint fits the budget, and (when possible)
    the grid keeps >= 2 steps so both v7x TensorCores are used."""
    divisors = [d for d in range(1, B + 1) if B % d == 0]
    legal = [d for d in divisors if (d * R) % 8 == 0 or d == B]
    if not legal:
        legal = [B]
    fitting = [d for d in legal if 4 * d * R * L * itemsize <= budget_bytes]
    if not fitting:
        return min(legal)
    multi = [d for d in fitting if B // d >= 2]
    if multi:
        return max(multi)
    return max(fitting)


def _se_kernel(x_ref, poolm_ref, batsel_ref, unfold_ref,
               w1_ref, b1_ref, w2_ref, b2_ref, o_ref):
    # x_ref: (Bt*R, L) -- Bt batch elements, R = C*G folded sublane rows each,
    # L lanes (multiple of 128 in the packed path). Channel c of a batch element
    # owns rows [c*G, (c+1)*G) of that element's row block.
    x = x_ref[...]
    xf = x.astype(jnp.float32)

    # Squeeze: spatial mean per (batch, channel). Lane-reduce once over the big
    # tile, then fold row-groups / split batch columns with tiny 0/1 matmuls
    # (no in-kernel transposes or reshapes anywhere).
    row_sum = jnp.sum(xf, axis=1, keepdims=True)                 # (BR, 1)
    per_batch = row_sum * batsel_ref[...]                         # (BR, Bt)
    y = jnp.dot(poolm_ref[...], per_batch,
                preferred_element_type=jnp.float32)               # (C, Bt) spatial means

    # Excite: fc1 -> ReLU -> fc2 -> h_sigmoid. Weights arrive pre-transposed, so the
    # pooled vector stays in column form end-to-end. (MXU is nearly empty for these
    # tiny dots; that is fine -- the kernel is bound by the read/write of x.)
    h = jnp.dot(w1_ref[...], y, preferred_element_type=jnp.float32) + b1_ref[...]
    h = jnp.maximum(h, 0.0)                                       # (HID, Bt)
    s = jnp.dot(w2_ref[...], h, preferred_element_type=jnp.float32) + b2_ref[...]
    s = jnp.clip(s + 3.0, 0.0, 6.0) * (1.0 / 6.0)                 # (C, Bt) h_sigmoid

    # Scatter the per-(batch, channel) scale back onto the folded rows, then rescale x
    # with a lane-broadcast multiply and store in the input dtype.
    t = jnp.dot(unfold_ref[...], s,
                preferred_element_type=jnp.float32)               # (BR, Bt)
    s_rows = jnp.sum(t * batsel_ref[...], axis=1, keepdims=True)  # (BR, 1)
    o_ref[...] = (xf * s_rows).astype(o_ref.dtype)


def se_layer(x, w1, b1, w2, b2, *, vmem_budget_bytes=24 * 1024 * 1024):
    """SELayer forward. x: (B, C, H, W); w1: (C, HID); b1: (1, HID); w2: (HID, C);
    b2: (1, C). Returns x * h_sigmoid(fc2(relu(fc1(mean_HW(x)))))."""
    B, C, H, W = x.shape
    HID = w1.shape[1]
    HW = H * W

    # Lane-dense / sublane-full packing of each batch element's (C, HW) slab.
    G, L = _pack_geometry(C, HW)
    R = C * G                                  # folded sublane rows per batch element
    x2 = x.reshape(B * R, L)                   # contiguous view: free

    # Several batch elements per grid step -> multi-KB..MB tiles per step.
    Bt = _pick_batch_tile(B, R, L, x.dtype.itemsize, vmem_budget_bytes)
    BR = Bt * R
    grid = (B // Bt,)

    # Tiny host-built constant matrices (block-local; identical for every grid step).
    r_idx = jnp.arange(BR)
    c_of_r = (r_idx // G) % C                  # channel of each folded row
    b_of_r = r_idx // R                        # block-local batch index of each row
    unfold = (c_of_r[:, None] == jnp.arange(C)[None, :]).astype(jnp.float32)   # (BR, C)
    poolm = unfold.T * (1.0 / HW)                                              # (C, BR)
    batsel = (b_of_r[:, None] == jnp.arange(Bt)[None, :]).astype(jnp.float32)  # (BR, Bt)

    # Pre-transpose the FC params host-side so the kernel never transposes.
    w1t = w1.T                                 # (HID, C)
    b1c = b1.reshape(HID, 1)                   # (HID, 1)
    w2t = w2.T                                 # (C, HID)
    b2c = b2.reshape(C, 1)                     # (C, 1)

    tile_bytes = BR * L * x.dtype.itemsize
    # Raise the scoped-VMEM cap with the tile size, but stay under ~48 MiB so the
    # same blocking also fits v7x's 64 MiB per-TensorCore VMEM with 2-deep buffering.
    vmem_limit = int(min(48 * 1024 * 1024,
                         max(16 * 1024 * 1024, 6 * tile_bytes + (4 << 20))))

    cost = pl.CostEstimate(
        flops=int(3 * x.size + 4 * B * C * HID),
        transcendentals=0,
        bytes_accessed=int(2 * x.size * x.dtype.itemsize),
    )

    out = pl.pallas_call(
        _se_kernel,
        out_shape=jax.ShapeDtypeStruct((B * R, L), x.dtype),
        grid=grid,
        in_specs=[
            pl.BlockSpec((BR, L), lambda i: (i, 0)),     # x tile (Bt batch elements)
            pl.BlockSpec((C, BR), lambda i: (0, 0)),     # pooling / fold-average matrix
            pl.BlockSpec((BR, Bt), lambda i: (0, 0)),    # batch-select indicator
            pl.BlockSpec((BR, C), lambda i: (0, 0)),     # unfold indicator
            pl.BlockSpec((HID, C), lambda i: (0, 0)),    # fc1 weight (pre-transposed)
            pl.BlockSpec((HID, 1), lambda i: (0, 0)),    # fc1 bias (column)
            pl.BlockSpec((C, HID), lambda i: (0, 0)),    # fc2 weight (pre-transposed)
            pl.BlockSpec((C, 1), lambda i: (0, 0)),      # fc2 bias (column)
        ],
        out_specs=pl.BlockSpec((BR, L), lambda i: (i, 0)),
        compiler_params=pltpu.CompilerParams(
            dimension_semantics=("parallel",),
            vmem_limit_bytes=vmem_limit),
        cost_estimate=cost,
    )(x2, poolm, batsel, unfold, w1t, b1c, w2t, b2c)

    return out.reshape(B, C, H, W)


def se_layer_ref(x, w1, b1, w2, b2):
    """Pure-JAX reference matching the PyTorch SELayer forward."""
    y = jnp.mean(x, axis=(2, 3))
    y = jnp.maximum(y @ w1 + b1, 0.0)
    y = y @ w2 + b2
    y = jnp.clip(y + 3.0, 0.0, 6.0) / 6.0
    return x * y[:, :, None, None]


# ---------------------------------------------------------------------------
# MobileNet.forward / forward_to_onnx head: avgpool -> flatten -> spoofer -> softmax
# ---------------------------------------------------------------------------

def _head_kernel(x_ref, wrow_ref, batsel_t_ref, b_ref, pooled_ref, prob_ref):
    # x_ref: (B*C, HW). Tiny head: one grid step; the pooled read of x dominates.
    xf = x_ref[...].astype(jnp.float32)
    pooled = jnp.mean(xf, axis=1, keepdims=True)                  # (B*C, 1)
    # spoofer Linear done without reshapes: row r already carries w[c(r), :].
    logits = jnp.dot(batsel_t_ref[...], pooled * wrow_ref[...],
                     preferred_element_type=jnp.float32) + b_ref[...]   # (B, 2)
    m = jnp.max(logits, axis=1, keepdims=True)
    e = jnp.exp(logits - m)
    prob = e / jnp.sum(e, axis=1, keepdims=True)                  # softmax
    pooled_ref[...] = pooled.astype(pooled_ref.dtype)
    prob_ref[...] = prob.astype(prob_ref.dtype)


def mobilenet_head(feats, w_sp, b_sp):
    """feats: (B, C, H, W) output of conv_last; w_sp: (C, 2); b_sp: (1, 2).
    Returns (avgpool output (B, C, 1, 1), softmax(spoofer(flatten(pool))))."""
    B, C, H, W = feats.shape
    HW = H * W
    x2 = feats.reshape(B * C, HW)
    wrow = jnp.tile(w_sp, (B, 1))                                             # (B*C, 2)
    batsel_t = (jnp.arange(B)[:, None]
                == (jnp.arange(B * C) // C)[None, :]).astype(jnp.float32)     # (B, B*C)

    pooled, prob = pl.pallas_call(
        _head_kernel,
        out_shape=(jax.ShapeDtypeStruct((B * C, 1), feats.dtype),
                   jax.ShapeDtypeStruct((B, 2), jnp.float32)),
        grid=(1,),
        in_specs=[
            pl.BlockSpec((B * C, HW), lambda i: (0, 0)),
            pl.BlockSpec((B * C, 2), lambda i: (0, 0)),
            pl.BlockSpec((B, B * C), lambda i: (0, 0)),
            pl.BlockSpec((1, 2), lambda i: (0, 0)),
        ],
        out_specs=(pl.BlockSpec((B * C, 1), lambda i: (0, 0)),
                   pl.BlockSpec((B, 2), lambda i: (0, 0))),
    )(x2, wrow, batsel_t, b_sp)
    # TODO(synk): multi-head make_logits branches (lightning/spoof_type/real_atr)
    # follow the same linear(+sigmoid) pattern and are not ported here.
    return pooled.reshape(B, C, 1, 1), prob


def mobilenet_head_ref(feats, w_sp, b_sp):
    pooled = jnp.mean(feats, axis=(2, 3))
    prob = jax.nn.softmax(pooled @ w_sp + b_sp, axis=-1)
    return pooled[:, :, None, None], prob


# ---------------------------------------------------------------------------

if __name__ == "__main__":
    key = jax.random.PRNGKey(0)

    # --- SE block at a few small shapes (exercises packed, batched and 7x7 paths) ---
    for (B, C, H, W) in [(2, 4, 16, 16), (4, 4, 16, 16), (2, 8, 7, 7)]:
        reduction = 4
        HID = make_divisible(C // reduction, 8)
        key, kx, k1, kb1, k2, kb2 = jax.random.split(key, 6)
        x = jax.random.normal(kx, (B, C, H, W), dtype=jnp.float32)
        w1 = jax.random.normal(k1, (C, HID), dtype=jnp.float32) * 0.5
        b1 = jax.random.normal(kb1, (1, HID), dtype=jnp.float32) * 0.1
        w2 = jax.random.normal(k2, (HID, C), dtype=jnp.float32) * 0.5
        b2 = jax.random.normal(kb2, (1, C), dtype=jnp.float32) * 0.1

        out = jax.block_until_ready(se_layer(x, w1, b1, w2, b2))
        ref = se_layer_ref(x, w1, b1, w2, b2)
        assert out.shape == x.shape
        assert jnp.allclose(out, ref, atol=1e-5, rtol=1e-5), f"SE mismatch at {(B, C, H, W)}"

    # --- MobileNet forward (avgpool) + forward_to_onnx (spoofer + softmax) head ---
    B, C, H, W = 2, 32, 16, 16          # embeding_dim = 32
    key, kx, kw, kb = jax.random.split(key, 4)
    feats = jax.random.normal(kx, (B, C, H, W), dtype=jnp.float32)
    w_sp = jax.random.normal(kw, (C, 2), dtype=jnp.float32) * 0.5
    b_sp = jax.random.normal(kb, (1, 2), dtype=jnp.float32) * 0.1

    pooled, prob = mobilenet_head(feats, w_sp, b_sp)
    pooled = jax.block_until_ready(pooled)
    prob = jax.block_until_ready(prob)
    pooled_ref, prob_ref = mobilenet_head_ref(feats, w_sp, b_sp)
    assert pooled.shape == (B, C, 1, 1) and prob.shape == (B, 2)
    assert jnp.allclose(pooled, pooled_ref, atol=1e-5, rtol=1e-5), "pool mismatch"
    assert jnp.allclose(prob, prob_ref, atol=1e-5, rtol=1e-5), "softmax head mismatch"

    print("KERNEL_OK")
</pallas_src>

<mosaic_0001>
module attributes {stable_mosaic.version = 11 : i64} {
  func.func @_se_kernel(%arg0: i32, %arg1: memref<8x128xf32, #tpu.memory_space<vmem>>, %arg2: memref<4x8xf32, #tpu.memory_space<vmem>>, %arg3: memref<8x1xf32, #tpu.memory_space<vmem>>, %arg4: memref<8x4xf32, #tpu.memory_space<vmem>>, %arg5: memref<8x4xf32, #tpu.memory_space<vmem>>, %arg6: memref<8x1xf32, #tpu.memory_space<vmem>>, %arg7: memref<4x8xf32, #tpu.memory_space<vmem>>, %arg8: memref<4x1xf32, #tpu.memory_space<vmem>>, %arg9: memref<8x128xf32, #tpu.memory_space<vmem>>) attributes {dimension_semantics = [#tpu.dimension_semantics<parallel>], iteration_bounds = array<i64: 2>, scalar_prefetch = 0 : i64, scratch_operands = 0 : i64, tpu.core_type = #tpu.core_type<tc>, window_params = [{transform_indices = @transform_0, window_bounds = array<i64: 8, 128>}, {pipeline_mode = #tpu.pipeline_mode<synchronous>, transform_indices = @transform_1, window_bounds = array<i64: 4, 8>}, {pipeline_mode = #tpu.pipeline_mode<synchronous>, transform_indices = @transform_2, window_bounds = array<i64: 8, 1>}, {pipeline_mode = #tpu.pipeline_mode<synchronous>, transform_indices = @transform_3, window_bounds = array<i64: 8, 4>}, {pipeline_mode = #tpu.pipeline_mode<synchronous>, transform_indices = @transform_4, window_bounds = array<i64: 8, 4>}, {pipeline_mode = #tpu.pipeline_mode<synchronous>, transform_indices = @transform_5, window_bounds = array<i64: 8, 1>}, {pipeline_mode = #tpu.pipeline_mode<synchronous>, transform_indices = @transform_6, window_bounds = array<i64: 4, 8>}, {pipeline_mode = #tpu.pipeline_mode<synchronous>, transform_indices = @transform_7, window_bounds = array<i64: 4, 1>}, {transform_indices = @transform_8, window_bounds = array<i64: 8, 128>}]} {
    %c0 = arith.constant 0 : index
    %c0_0 = arith.constant 0 : index
    %0 = vector.load %arg1[%c0, %c0_0] : memref<8x128xf32, #tpu.memory_space<vmem>>, vector<8x128xf32>
    %cst = arith.constant dense<0.000000e+00> : vector<8xf32>
    %1 = vector.multi_reduction <add>, %0, %cst [1] : vector<8x128xf32> to vector<8xf32>
    %2 = vector.shape_cast %1 : vector<8xf32> to vector<8x1xf32>
    %c0_1 = arith.constant 0 : index
    %c0_2 = arith.constant 0 : index
    %3 = vector.load %arg3[%c0_1, %c0_2] : memref<8x1xf32, #tpu.memory_space<vmem>>, vector<8x1xf32>
    %4 = arith.mulf %2, %3 : vector<8x1xf32>
    %c0_3 = arith.constant 0 : index
    %c0_4 = arith.constant 0 : index
    %5 = vector.load %arg2[%c0_3, %c0_4] : memref<4x8xf32, #tpu.memory_space<vmem>>, vector<4x8xf32>
    %cst_5 = arith.constant dense<0.000000e+00> : vector<4x1xf32>
    %6 = tpu.matmul %5, %4, %cst_5 {dimension_numbers = #tpu.dot_dimension_numbers<[1], [0], [0], [1], [0, 0, 1, 1], [], []>} : vector<4x8xf32>, vector<8x1xf32>, vector<4x1xf32> -> vector<4x1xf32>
    %c0_6 = arith.constant 0 : index
    %c0_7 = arith.constant 0 : index
    %7 = vector.load %arg5[%c0_6, %c0_7] : memref<8x4xf32, #tpu.memory_space<vmem>>, vector<8x4xf32>
    %cst_8 = arith.constant dense<0.000000e+00> : vector<8x1xf32>
    %8 = tpu.matmul %7, %6, %cst_8 {dimension_numbers = #tpu.dot_dimension_numbers<[1], [0], [0], [1], [0, 0, 1, 1], [], []>} : vector<8x4xf32>, vector<4x1xf32>, vector<8x1xf32> -> vector<8x1xf32>
    %c0_9 = arith.constant 0 : index
    %c0_10 = arith.constant 0 : index
    %9 = vector.load %arg6[%c0_9, %c0_10] : memref<8x1xf32, #tpu.memory_space<vmem>>, vector<8x1xf32>
    %10 = arith.addf %8, %9 : vector<8x1xf32>
    %cst_11 = arith.constant 0.000000e+00 : f32
    %11 = vector.broadcast %cst_11 : f32 to vector<8x1xf32>
    %12 = arith.maximumf %10, %11 : vector<8x1xf32>
    %c0_12 = arith.constant 0 : index
    %c0_13 = arith.constant 0 : index
    %13 = vector.load %arg7[%c0_12, %c0_13] : memref<4x8xf32, #tpu.memory_space<vmem>>, vector<4x8xf32>
    %cst_14 = arith.constant dense<0.000000e+00> : vector<4x1xf32>
    %14 = tpu.matmul %13, %12, %cst_14 {dimension_numbers = #tpu.dot_dimension_numbers<[1], [0], [0], [1], [0, 0, 1, 1], [], []>} : vector<4x8xf32>, vector<8x1xf32>, vector<4x1xf32> -> vector<4x1xf32>
    %c0_15 = arith.constant 0 : index
    %c0_16 = arith.constant 0 : index
    %15 = vector.load %arg8[%c0_15, %c0_16] : memref<4x1xf32, #tpu.memory_space<vmem>>, vector<4x1xf32>
    %16 = arith.addf %14, %15 : vector<4x1xf32>
    %cst_17 = arith.constant 3.000000e+00 : f32
    %17 = vector.broadcast %cst_17 : f32 to vector<4x1xf32>
    %18 = arith.addf %16, %17 : vector<4x1xf32>
    %cst_18 = arith.constant 0.000000e+00 : f32
    %cst_19 = arith.constant 6.000000e+00 : f32
    %19 = vector.broadcast %cst_18 : f32 to vector<4x1xf32>
    %20 = arith.maximumf %19, %18 : vector<4x1xf32>
    %21 = vector.broadcast %cst_19 : f32 to vector<4x1xf32>
    %22 = arith.minimumf %21, %20 : vector<4x1xf32>
    %cst_20 = arith.constant 0.166666672 : f32
    %23 = vector.broadcast %cst_20 : f32 to vector<4x1xf32>
    %24 = arith.mulf %22, %23 : vector<4x1xf32>
    %c0_21 = arith.constant 0 : index
    %c0_22 = arith.constant 0 : index
    %25 = vector.load %arg4[%c0_21, %c0_22] : memref<8x4xf32, #tpu.memory_space<vmem>>, vector<8x4xf32>
    %cst_23 = arith.constant dense<0.000000e+00> : vector<8x1xf32>
    %26 = tpu.matmul %25, %24, %cst_23 {dimension_numbers = #tpu.dot_dimension_numbers<[1], [0], [0], [1], [0, 0, 1, 1], [], []>} : vector<8x4xf32>, vector<4x1xf32>, vector<8x1xf32> -> vector<8x1xf32>
    %c0_24 = arith.constant 0 : index
    %c0_25 = arith.constant 0 : index
    %27 = vector.load %arg3[%c0_24, %c0_25] : memref<8x1xf32, #tpu.memory_space<vmem>>, vector<8x1xf32>
    %28 = arith.mulf %26, %27 : vector<8x1xf32>
    %cst_26 = arith.constant dense<0.000000e+00> : vector<8xf32>
    %29 = vector.multi_reduction <add>, %28, %cst_26 [1] : vector<8x1xf32> to vector<8xf32>
    %30 = vector.shape_cast %29 : vector<8xf32> to vector<8x1xf32>
    %31 = vector.broadcast %30 : vector<8x1xf32> to vector<8x128xf32>
    %32 = arith.mulf %0, %31 : vector<8x128xf32>
    %c0_27 = arith.constant 0 : index
    %c0_28 = arith.constant 0 : index
    %33 = vector.load %arg9[%c0_27, %c0_28] : memref<8x128xf32, #tpu.memory_space<vmem>>, vector<8x128xf32>
    tpu.vector_store %arg9[%c0_27, %c0_28], %32 {strides = array<i32>} : memref<8x128xf32, #tpu.memory_space<vmem>>, vector<8x128xf32>,
    return
  }
  func.func @transform_0(%arg0: i32) -> (i32, i32) {
    %c0_i32 = arith.constant 0 : i32
    %c0_i32_0 = arith.constant 0 : i32
    return %arg0, %c0_i32 : i32, i32
  }
  func.func @transform_1(%arg0: i32) -> (i32, i32) {
    %c0_i32 = arith.constant 0 : i32
    %c0_i32_0 = arith.constant 0 : i32
    %c0_i32_1 = arith.constant 0 : i32
    return %c0_i32, %c0_i32_0 : i32, i32
  }
  func.func @transform_2(%arg0: i32) -> (i32, i32) {
    %c0_i32 = arith.constant 0 : i32
    %c0_i32_0 = arith.constant 0 : i32
    %c0_i32_1 = arith.constant 0 : i32
    return %c0_i32, %c0_i32_0 : i32, i32
  }
  func.func @transform_3(%arg0: i32) -> (i32, i32) {
    %c0_i32 = arith.constant 0 : i32
    %c0_i32_0 = arith.constant 0 : i32
    %c0_i32_1 = arith.constant 0 : i32
    return %c0_i32, %c0_i32_0 : i32, i32
  }
  func.func @transform_4(%arg0: i32) -> (i32, i32) {
    %c0_i32 = arith.constant 0 : i32
    %c0_i32_0 = arith.constant 0 : i32
    %c0_i32_1 = arith.constant 0 : i32
    return %c0_i32, %c0_i32_0 : i32, i32
  }
  func.func @transform_5(%arg0: i32) -> (i32, i32) {
    %c0_i32 = arith.constant 0 : i32
    %c0_i32_0 = arith.constant 0 : i32
    %c0_i32_1 = arith.constant 0 : i32
    return %c0_i32, %c0_i32_0 : i32, i32
  }
  func.func @transform_6(%arg0: i32) -> (i32, i32) {
    %c0_i32 = arith.constant 0 : i32
    %c0_i32_0 = arith.constant 0 : i32
    %c0_i32_1 = arith.constant 0 : i32
    return %c0_i32, %c0_i32_0 : i32, i32
  }
  func.func @transform_7(%arg0: i32) -> (i32, i32) {
    %c0_i32 = arith.constant 0 : i32
    %c0_i32_0 = arith.constant 0 : i32
    %c0_i32_1 = arith.constant 0 : i32
    return %c0_i32, %c0_i32_0 : i32, i32
  }
  func.func @transform_8(%arg0: i32) -> (i32, i32) {
    %c0_i32 = arith.constant 0 : i32
    %c0_i32_0 = arith.constant 0 : i32
    return %arg0, %c0_i32 : i32, i32
  }
}

</mosaic_0001>

<bundles_post_ra>
// kernel: tpu_custom_call.1
= control target key start
LH: loop header
LB: loop body
LE: loop exit
PB: predicated region body
PF: predicated region fallthrough
CT: control target
= control target key end

     0   :  { %13 = vsyncpa [#allocation3], 0  ;;  %s779_s0 = inlined_call_operand.vmem [shape: f32[16,128], index: 0, kind: input, shape index: {}]   ;;  %s780_s1 = inlined_call_operand.vmem [shape: f32[4,8], index: 1, kind: input, shape index: {}]   ;;  %s781_s2 = inlined_call_operand.vmem [shape: f32[8,1], index: 2, kind: input, shape index: {}]   ;;  %s782_s3 = inlined_call_operand.vmem [shape: f32[8,4], index: 3, kind: input, shape index: {}]   ;;  %s783_s4 = inlined_call_operand.vmem [shape: f32[8,4], index: 4, kind: input, shape index: {}]   ;;  %s784_s5 = inlined_call_operand.vmem [shape: f32[8,1], index: 5, kind: input, shape index: {}]   ;;  %s785_s6 = inlined_call_operand.vmem [shape: f32[4,8], index: 6, kind: input, shape index: {}]   ;;  %s786_s7 = inlined_call_operand.vmem [shape: f32[4,1], index: 7, kind: input, shape index: {}]   ;;  %s787_s8 = inlined_call_operand.hbm [shape: f32[16,128], index: 8, kind: output, shape index: {}]  }
   0x1   :  { %15 = vsyncpa [#allocation3 + $0x1], 0  ;;  %s669_s27 = smov 0   ;;  %s671_s28 = smov 0  }
   0x2   :  { %s673_s29 = smov 0   ;;  %s675_s30 = smov 0  }
   0x3 LB: > { %s690_s9 = sadd.s32 4294967295, %s621_s30   ;;  %s502_s10 = sadd.s32 4294967294, %s621_s30   ;;  %s621_s30 = sphi %s675_s30, %s793_s30   ;;  %s617_s29 = sphi %s673_s29, %s792_s29   ;;  %s613_s28 = sphi %s671_s28, %s791_s28   ;;  %s609_s27 = sphi %s669_s27, %s790_s27  }
   0x4   : > { %s694_s11 = sadd.s32 1, %s621_s30   ;;  %s201_s12 = sadd.s32 1, %s617_s29 }
   0x5   : > { %s198_s13 = ssub.s32 %s621_s30, %s694_s11  ;;  %p211_p0 = scmp.ne.s32.totalorder %s617_s29, %s613_s28 }
   0x6   : > { %p199_p1 = scmp.eq.s32.totalorder %s198_s13, 0  ;;  %p212_p2 = scmp.eq.s32.totalorder %s690_s9, 1 }
   0x7   : > { %p217_p3 = scmp.ne.s32.totalorder %s613_s28, %s609_s27  ;;  %p218_p4 = scmp.eq.s32.totalorder %s502_s10, 1 }
   0x8   : > { %s705_s14 = scalar_select %p199_p1, %s617_s29, %s201_s12  }
   0x9   : > { %p707_p5 = por %p212_p2, %p211_p0  ;;  %p711_p6 = por %p218_p4, %p217_p3 }
   0xa   : > { %p505_p7 = scmp.ge.s32.totalorder %s621_s30, 1  ;;  %p264_p8 = scmp.lt.s32.totalorder %s621_s30, 3 }
   0xc   : > { %p265_p9 = pnand %p505_p7, %p264_p8 }
   0xd   : > { %p297_p10 = scmp.lt.s32.totalorder (!%p265_p9), %s690_s9, 1  ;;  %s294_s23 = sand.u32 (!%p265_p9), 1, %s613_s28  }
   0xe   : > { %268 = sbr.rel (%p265_p9) target bundleno = 798 (0x31e), region = 52  ;;  %s506_s24 = sshll.u32 (!%p265_p9), %s294_s23, 3 }
   0xf   : > { %s515_s25 = sshll.u32 (!%p265_p9), %s690_s9, 3  ;;  %s296_s13 = scalar_lea.vmem (!%p265_p9), [#allocation2], %s506_s24 }
  0x10   : > { %s438_s12 = scalar_lea.hbm (!%p265_p9), %s787_s8, %s515_s25  ;;  %s428_s19 = scalar_lea.sflag (!%p265_p9), [#allocation3], %s294_s23 }
  0x11   : > { %s579_s25 = scalar_lea.hbm (!%p265_p9), %s787_s8, 16 }
  0x13   : > { %s298_s17 = scalar_select %p297_p10, %s690_s9, 1  ;;  %v304_v1 = vld [vmem:[%s781_s2] sm:$0xff]  ;;  %vm307_vm0 = vcmask 64512   ;;  %vm337_vm1 = vcmask 1043456   ;;  %vm333_vm2 = vcmask 31744   ;;  %v623_v20 = vmov 0  }
  0x14   : > { %v306_v4 = vld [vmem:[%s780_s1] sm:$0xf]  ;;  %558 = vset.pattern.permute.xlu0 %v623_v20 }
  0x15   : > { %s507_s18 = sshll.u32 %s298_s17, 3  ;;  %v331_v5 = vld [vmem:[%s783_s4] sm:$0xff]  ;;  %s440_s17 = sshll.u32 %s296_s13, 4  ;;  %s441_s17 = int_to_ptr.vmem [resolvable:$true] %s440_s17 }
  0x16   : > { %s300_s21 = scalar_lea.vmem %s779_s0, %s507_s18  ;;  %v332_v7 = vld [vmem:[%s784_s5] sm:$0xff]  ;;  %s442_s18 = sshll.u32 %s438_s12, 4  ;;  %s443_s18 = int_to_ptr.hbm [resolvable:$true] %s442_s18 }
  0x17   : > { %v301_v0 = vld [vmem:[%s300_s21] sm:$0xff]  ;;  %s573_s20 = sshra.s32 %s443_s18, 4  ;;  %s574_s20 = int_to_ptr.hbm [resolvable:$true] %s573_s20 }
  0x18   : > { %302 = vadd.xlane.f32.xlu0 %v301_v0  ;;  %v362_v11 = vld [vmem:[%s785_s6] sm:$0xf]  ;;  %s575_s21 = scalar_lea.hbm %s574_s20, 8  ;;  %p580_p0 = scmp.lt.s32.totalorder %s574_s20, %s787_s8 }
  0x19   : > { %v363_v12 = vld [vmem:[%s786_s7] sm:$0xf]  ;;  %p576_p11 = scmp.ne.s32.totalorder %s574_s20, %s575_s21  ;;  %p581_p1 = scmp.lt.s32.totalorder %s579_s25, %s575_s21 }
  0x1a   : > { %v391_v19 = vld [vmem:[%s782_s3] sm:$0xff] }
  0x1b   : > { %p577_p12 = pnand %p576_p11, %p707_p5  ;;  %p582_p2 = por %p581_p1, %p580_p0 }
  0x1d   : > { %p578_p13 = pneg %p577_p12 }
  0x1f   : > { %p583_p3 = pnand %p582_p2, %p578_p13 }
  0x8b   : > { %v303_v2 = vpop.xlane.xlu0 %302 }
  0x8c   : > { %v305_v3 = vmul.f32 %v304_v1, %v303_v2 }
  0x8e   : > { %326 = vmatpush.msra.mxu0 %v305_v3 }
  0x8f   : > { %508 = vmatmul.msk.f32.vlgmr.msra.gmra.mxu0 %vm307_vm0, %v306_v4 }
 0x10c   : > { %v328_v6 = vpop.f32.mrf.mxu0 }
 0x10d   : > { %509 = vmatpush.msk.msra.mxu1 %vm337_vm1, %v328_v6 }
 0x10e   : > { %510 = vmatmul.msk.f32.vlgmr.msra.gmra.mxu1 %vm333_vm2, %v331_v5 }
 0x18b   : > { %v358_v8 = vpop.f32.mrf.mxu1 }
 0x18c   : > { %v359_v9 = vadd.f32 %v358_v8, %v332_v7 }
 0x18e   : > { %v361_v10 = vmax.f32 %v359_v9, 0.0 }
 0x190   : > { %382 = vmatpush.msra.mxu2 %v361_v10 }
 0x191   : > { %511 = vmatmul.msk.f32.vlgmr.msra.gmra.mxu2 %vm307_vm0, %v362_v11 }
 0x214   : > { %v384_v13 = vpop.f32.mrf.mxu2 }
 0x215   : > { %v385_v14 = vadd.f32 %v384_v13, %v363_v12 }
 0x217   : > { %v387_v15 = vadd.f32 3.0, %v385_v14 }
 0x219   : > { %v388_v16 = vmax.f32 %v387_v15, 0.0 }
 0x21b   : > { %v389_v17 = vmin.f32 %v388_v16, 6.0 }
 0x21d   : > { %v390_v18 = vmul.f32 0.16666667, %v389_v17 }
 0x21f   : > { %512 = vmatpush.msk.msra.mxu3 %vm337_vm1, %v390_v18 }
 0x220   : > { %513 = vmatmul.msk.f32.vlgmr.msra.gmra.mxu3 %vm333_vm2, %v391_v19 }
 0x2a3   : > { %v415_v21 = vpop.f32.mrf.mxu3 }
 0x2a4   : > { %v418_v22 = vmul.f32 %v415_v21, %v304_v1 }
 0x2a6   : > { %422 = vperm.xlu0 %558, %v418_v22  }
 0x318   : > { %v423_v23 = vpop.permute.xlu0 %422 }
 0x319   : > { %v425_v24 = vmul.f32 %v423_v23, %v301_v0 }
 0x31b   : > { %426 = vst [vmem:[%s296_s13] sm:$0xff] %v425_v24 }
 0x31c   : > { %586 = shalt.err (!%p583_p3)
}
 0x31d   : > { %518 = dma.vmem_to_hbm [thread:$0]  (%p707_p5), %s441_s17, 128, %s443_s18, %s428_s19  }
 0x31e PF: > { %p524_p4 = scmp.ge.s32.totalorder %s621_s30, 2  ;;  %s454_s23 = sand.u32 1, %s609_s27  }
 0x31f   : > { %s455_s10 = scalar_lea.sflag [#allocation3], %s454_s23 }
 0x320   : > { %p521_p7 = pnand %p524_p4, %p711_p6 }
 0x322   : > { %p522_p8 = pneg %p521_p7 }
 0x324   : > { %604 = dma.done.wait (%p522_p8), %s455_s10, 128  }
 0x325   : > { %606 = vsyncadd (%p522_p8), %s455_s10, 4294967168  ;;  %p18_p9 = scmp.ge.s32.totalorder %s694_s11, 4   ;;  %s790_s27 = smov %s613_s28 }
 0x326   : > { %s791_s28 = smov %s617_s29  ;;  %s792_s29 = smov %s705_s14 }
 0x327   : > { %s793_s30 = smov %s694_s11  ;;  %20 = sbr.rel (!%p18_p9) target bundleno = 3 (0x3), region = 87 }
 0x32c   :  { %461 = vsyncpa [#allocation3], 1 }
 0x32d   :  { %463 = vsyncpa [#allocation3 + $0x1], 1 }

</bundles_post_ra>
